<compile_context>
chip_gen: v6e
topology: v6e:2x2x1
jax: 0.10.0
libtpu: 0.0.40
codegen_flags: <defaults>
</compile_context>

<pallas_src>
import functools

import jax
import jax.numpy as jnp
from jax.experimental import pallas as pl
from jax.experimental.pallas import tpu as pltpu


def _sumsq(v):
    """Sum of squares of a 2D tile -> (1, 1) f32 (lane reduce first, then sublane reduce)."""
    return jnp.sum(jnp.sum(v * v, axis=1, keepdims=True), axis=0, keepdims=True)


def _cdiff_sq_sum(x):
    """Sum of squares of the UNscaled central difference of `x` (shape (S, Dt)) along axis 0.

    Reference builds cat([x[-2:-1], x, x[1:2]], dim=S) and takes (xc[2:] - xc[:-2]).  Rows 0 and
    S-1 of that difference are both (x[1] - x[S-2]), hence the edge term counted twice.  The
    (0.5 * resolution) factor is hoisted out and applied at finalize.
    """
    s = x.shape[0]
    interior = x[2:, :] - x[: s - 2, :]
    edge = x[1:2, :] - x[s - 2 : s - 1, :]
    return _sumsq(interior) + 2.0 * _sumsq(edge)


def _loss_kernel(pred_ref, gt_ref, out_ref,
                 diff_sq, gt_sq, d_diff_sq, d_gt_sq, pred_sum, d_sum,
                 *, batch, reduction, eps, w0, w1, scale):
    b = pl.program_id(0)
    dt = pl.program_id(1)
    last_b = pl.num_programs(0) - 1
    last_dt = pl.num_programs(1) - 1

    @pl.when(jnp.logical_and(b == 0, dt == 0))
    def _init_global():
        pred_sum[...] = jnp.zeros_like(pred_sum)
        d_sum[...] = jnp.zeros_like(d_sum)

    @pl.when(dt == 0)
    def _init_batch():
        diff_sq[...] = jnp.zeros_like(diff_sq)
        gt_sq[...] = jnp.zeros_like(gt_sq)
        d_diff_sq[...] = jnp.zeros_like(d_diff_sq)
        d_gt_sq[...] = jnp.zeros_like(d_gt_sq)

    p = pred_ref[...].astype(jnp.float32)    # (S, D_tile), upcast per tile, f32 accumulation
    g = gt_ref[...].astype(jnp.float32)
    u = p - g                                # central diff is linear -> reuse the difference

    diff_sq[...] += _sumsq(u)
    gt_sq[...] += _sumsq(g)
    d_diff_sq[...] += _cdiff_sq_sum(u)
    d_gt_sq[...] += _cdiff_sq_sum(g)

    @pl.when(dt == last_dt)
    def _finalize_batch():
        pred_ratio = jnp.sqrt(diff_sq[...]) / (jnp.sqrt(gt_sq[...]) + eps)
        # Hoisted scale applied BEFORE the 1e-6 eps: ||s*d|| / (||s*d_gt|| + 1e-6).
        d_ratio = (scale * jnp.sqrt(d_diff_sq[...])) / (scale * jnp.sqrt(d_gt_sq[...]) + 1e-6)
        pred_sum[...] += pred_ratio
        d_sum[...] += d_ratio

    @pl.when(jnp.logical_and(b == last_b, dt == last_dt))
    def _emit():
        pred_loss = pred_sum[...]
        if reduction:                 # static Python branch
            pred_loss = pred_loss / batch
        d_loss = d_sum[...] / batch   # inner _l2_norm call always uses reduction=True
        out_ref[...] = (w0 * pred_loss + w1 * d_loss).astype(out_ref.dtype)


def _pick_d_tile(s, d, itemsize, target_bytes=2 * 1024 * 1024):
    """Largest lane-aligned D tile dividing D with one (S, D_tile) input tile <= ~2 MiB.

    2 inputs x 2 pipeline buffers x 2 MiB = 8 MiB stays under v5e's 16 MiB scoped default and
    well under v7x's 64 MiB physical VMEM while still hitting ~85% of HBM roofline.
    """
    if d % 128 != 0:
        return d  # full-dim block satisfies the (8,128) rule (e.g. small feature dims)
    for cand in (4096, 2048, 1024, 512, 256, 128):
        if d % cand == 0 and s * cand * itemsize <= target_bytes:
            return cand
    return 128


def simple_operator_learning_l2_loss(pred, gt, *, reduction=True, eps=1e-6,
                                     weight=(1.0, 0.001), d_tile=None):
    assert pred.shape == gt.shape and pred.ndim == 3, "expected (batch, resolution, features)"
    b, s, d = pred.shape
    assert s >= 3, "central difference (same constraint as the PyTorch reference) needs S >= 3"
    itemsize = jnp.dtype(pred.dtype).itemsize
    if d_tile is None:
        d_tile = _pick_d_tile(s, d, itemsize)
    assert d % d_tile == 0
    n_dt = d // d_tile

    kernel = functools.partial(
        _loss_kernel,
        batch=float(b), reduction=bool(reduction), eps=float(eps),
        w0=float(weight[0]), w1=float(weight[1]), scale=0.5 * float(s),
    )

    # (None, S, D_tile): batch dim squeezed out; S whole (no halo needed); D lane-tiled.
    in_block = pl.BlockSpec((None, s, d_tile), lambda bi, di: (bi, 0, di))

    tile_bytes = s * d_tile * itemsize
    vmem_limit = int(min(max(4 * tile_bytes + (4 << 20), 16 << 20), 32 << 20))

    cost = pl.CostEstimate(
        flops=int(12 * b * s * d),
        transcendentals=int(4 * b),
        bytes_accessed=int(2 * b * s * d * itemsize + 4),
    )

    out = pl.pallas_call(
        kernel,
        out_shape=jax.ShapeDtypeStruct((1, 1), jnp.float32),
        grid_spec=pltpu.PrefetchScalarGridSpec(
            num_scalar_prefetch=0,
            grid=(b, n_dt),
            in_specs=[in_block, in_block],
            out_specs=pl.BlockSpec((1, 1), lambda bi, di: (0, 0)),
            scratch_shapes=[pltpu.VMEM((1, 1), jnp.float32)] * 6,
        ),
        compiler_params=pltpu.CompilerParams(
            # Both axes carry accumulator state in scratch (global batch sum), so both are
            # "arbitrary".  The kernel is HBM-bandwidth-bound; a single TC saturates HBM BW,
            # so foregoing megacore sharding on v7x costs nothing here.
            dimension_semantics=("arbitrary", "arbitrary"),
            vmem_limit_bytes=vmem_limit,
        ),
        cost_estimate=cost,
    )(pred, gt)
    return out[0, 0]


def _reference_loss(pred, gt, reduction=True, eps=1e-6, weight=(1.0, 0.001)):
    """Pure-JAX mirror of the PyTorch module, for correctness checking."""
    def l2_norm(p, g, red, e):
        n = p.shape[0]
        dn = jnp.linalg.norm(p.reshape(n, -1) - g.reshape(n, -1), axis=1)
        gn = jnp.linalg.norm(g.reshape(n, -1), axis=1) + e
        loss = jnp.sum(dn / gn)
        return loss / n if red else loss

    def cdiff(x, res):
        xc = jnp.concatenate([x[:, -2:-1], x, x[:, 1:2]], axis=1)
        return ((xc[:, 2:] - xc[:, :-2]) / 2) / (1.0 / res)

    pred_loss = l2_norm(pred, gt, reduction, eps)
    d_loss = l2_norm(cdiff(pred, pred.shape[1]), cdiff(gt, gt.shape[1]), True, 1e-6)
    return weight[0] * pred_loss + weight[1] * d_loss


if __name__ == "__main__":
    key = jax.random.PRNGKey(0)
    k1, k2, k3, k4 = jax.random.split(key, 4)

    # Case 1: small feature dim (full-D block, single D tile).
    B, S, D = 2, 16, 32
    pred = jax.random.normal(k1, (B, S, D), dtype=jnp.float32)
    gt = jax.random.normal(k2, (B, S, D), dtype=jnp.float32)
    loss = simple_operator_learning_l2_loss(pred, gt)
    jax.block_until_ready(loss)
    ref = _reference_loss(pred, gt)
    assert jnp.allclose(loss, ref, rtol=1e-5, atol=1e-6), (loss, ref)

    # Case 2: lane-aligned feature dim, forced D-tiling to exercise cross-tile accumulation.
    B2, S2, D2 = 2, 16, 256
    pred2 = jax.random.normal(k3, (B2, S2, D2), dtype=jnp.float32)
    gt2 = jax.random.normal(k4, (B2, S2, D2), dtype=jnp.float32)
    loss2 = simple_operator_learning_l2_loss(pred2, gt2, d_tile=128)
    jax.block_until_ready(loss2)
    ref2 = _reference_loss(pred2, gt2)
    assert jnp.allclose(loss2, ref2, rtol=1e-5, atol=1e-6), (loss2, ref2)

    print("KERNEL_OK")
</pallas_src>

<mosaic_0001>
module attributes {stable_mosaic.version = 11 : i64} {
  func.func @_loss_kernel(%arg0: i32, %arg1: i32, %arg2: memref<1x16x32xf32, #tpu.memory_space<vmem>>, %arg3: memref<1x16x32xf32, #tpu.memory_space<vmem>>, %arg4: memref<1x1xf32, #tpu.memory_space<vmem>>, %arg5: memref<1x1xf32, #tpu.memory_space<vmem>>, %arg6: memref<1x1xf32, #tpu.memory_space<vmem>>, %arg7: memref<1x1xf32, #tpu.memory_space<vmem>>, %arg8: memref<1x1xf32, #tpu.memory_space<vmem>>, %arg9: memref<1x1xf32, #tpu.memory_space<vmem>>, %arg10: memref<1x1xf32, #tpu.memory_space<vmem>>) attributes {dimension_semantics = [#tpu.dimension_semantics<arbitrary>, #tpu.dimension_semantics<arbitrary>], iteration_bounds = array<i64: 2, 1>, scalar_prefetch = 0 : i64, scratch_operands = 6 : i64, tpu.core_type = #tpu.core_type<tc>, window_params = [{transform_indices = @transform_0, window_bounds = array<i64: 1, 16, 32>}, {transform_indices = @transform_1, window_bounds = array<i64: 1, 16, 32>}, {pipeline_mode = #tpu.pipeline_mode<synchronous>, transform_indices = @transform_2, window_bounds = array<i64: 1, 1>}]} {
    %c0_i32 = arith.constant 0 : i32
    %0 = arith.cmpi eq, %arg0, %c0_i32 : i32
    %c0_i32_0 = arith.constant 0 : i32
    %1 = arith.cmpi eq, %arg1, %c0_i32_0 : i32
    %2 = arith.andi %0, %1 : i1
    %3 = arith.extui %2 : i1 to i32
    %c0_i32_1 = arith.constant 0 : i32
    %4 = arith.cmpi ne, %3, %c0_i32_1 : i32
    scf.if %4 {
      %cst_42 = arith.constant 0.000000e+00 : f32
      %81 = vector.broadcast %cst_42 : f32 to vector<1x1xf32>
      %c0_43 = arith.constant 0 : index
      %c0_44 = arith.constant 0 : index
      %82 = vector.load %arg9[%c0_43, %c0_44] : memref<1x1xf32, #tpu.memory_space<vmem>>, vector<1x1xf32>
      tpu.vector_store %arg9[%c0_43, %c0_44], %81 {strides = array<i32>} : memref<1x1xf32, #tpu.memory_space<vmem>>, vector<1x1xf32>,
      %cst_45 = arith.constant 0.000000e+00 : f32
      %83 = vector.broadcast %cst_45 : f32 to vector<1x1xf32>
      %c0_46 = arith.constant 0 : index
      %c0_47 = arith.constant 0 : index
      %84 = vector.load %arg10[%c0_46, %c0_47] : memref<1x1xf32, #tpu.memory_space<vmem>>, vector<1x1xf32>
      tpu.vector_store %arg10[%c0_46, %c0_47], %83 {strides = array<i32>} : memref<1x1xf32, #tpu.memory_space<vmem>>, vector<1x1xf32>,
    } else {
    }
    %c0_i32_2 = arith.constant 0 : i32
    %5 = arith.cmpi eq, %arg1, %c0_i32_2 : i32
    %6 = arith.extui %5 : i1 to i32
    %c0_i32_3 = arith.constant 0 : i32
    %7 = arith.cmpi ne, %6, %c0_i32_3 : i32
    scf.if %7 {
      %cst_42 = arith.constant 0.000000e+00 : f32
      %81 = vector.broadcast %cst_42 : f32 to vector<1x1xf32>
      %c0_43 = arith.constant 0 : index
      %c0_44 = arith.constant 0 : index
      %82 = vector.load %arg5[%c0_43, %c0_44] : memref<1x1xf32, #tpu.memory_space<vmem>>, vector<1x1xf32>
      tpu.vector_store %arg5[%c0_43, %c0_44], %81 {strides = array<i32>} : memref<1x1xf32, #tpu.memory_space<vmem>>, vector<1x1xf32>,
      %cst_45 = arith.constant 0.000000e+00 : f32
      %83 = vector.broadcast %cst_45 : f32 to vector<1x1xf32>
      %c0_46 = arith.constant 0 : index
      %c0_47 = arith.constant 0 : index
      %84 = vector.load %arg6[%c0_46, %c0_47] : memref<1x1xf32, #tpu.memory_space<vmem>>, vector<1x1xf32>
      tpu.vector_store %arg6[%c0_46, %c0_47], %83 {strides = array<i32>} : memref<1x1xf32, #tpu.memory_space<vmem>>, vector<1x1xf32>,
      %cst_48 = arith.constant 0.000000e+00 : f32
      %85 = vector.broadcast %cst_48 : f32 to vector<1x1xf32>
      %c0_49 = arith.constant 0 : index
      %c0_50 = arith.constant 0 : index
      %86 = vector.load %arg7[%c0_49, %c0_50] : memref<1x1xf32, #tpu.memory_space<vmem>>, vector<1x1xf32>
      tpu.vector_store %arg7[%c0_49, %c0_50], %85 {strides = array<i32>} : memref<1x1xf32, #tpu.memory_space<vmem>>, vector<1x1xf32>,
      %cst_51 = arith.constant 0.000000e+00 : f32
      %87 = vector.broadcast %cst_51 : f32 to vector<1x1xf32>
      %c0_52 = arith.constant 0 : index
      %c0_53 = arith.constant 0 : index
      %88 = vector.load %arg8[%c0_52, %c0_53] : memref<1x1xf32, #tpu.memory_space<vmem>>, vector<1x1xf32>
      tpu.vector_store %arg8[%c0_52, %c0_53], %87 {strides = array<i32>} : memref<1x1xf32, #tpu.memory_space<vmem>>, vector<1x1xf32>,
    } else {
    }
    %c0 = arith.constant 0 : index
    %c0_4 = arith.constant 0 : index
    %c0_5 = arith.constant 0 : index
    %8 = vector.load %arg2[%c0, %c0_4, %c0_5] : memref<1x16x32xf32, #tpu.memory_space<vmem>>, vector<1x16x32xf32>
    %9 = vector.shape_cast %8 : vector<1x16x32xf32> to vector<16x32xf32>
    %c0_6 = arith.constant 0 : index
    %c0_7 = arith.constant 0 : index
    %c0_8 = arith.constant 0 : index
    %10 = vector.load %arg3[%c0_6, %c0_7, %c0_8] : memref<1x16x32xf32, #tpu.memory_space<vmem>>, vector<1x16x32xf32>
    %11 = vector.shape_cast %10 : vector<1x16x32xf32> to vector<16x32xf32>
    %12 = arith.subf %9, %11 : vector<16x32xf32>
    %c0_9 = arith.constant 0 : index
    %c0_10 = arith.constant 0 : index
    %13 = vector.load %arg5[%c0_9, %c0_10] : memref<1x1xf32, #tpu.memory_space<vmem>>, vector<1x1xf32>
    %14 = arith.mulf %12, %12 : vector<16x32xf32>
    %cst = arith.constant dense<0.000000e+00> : vector<16xf32>
    %15 = vector.multi_reduction <add>, %14, %cst [1] : vector<16x32xf32> to vector<16xf32>
    %16 = vector.shape_cast %15 : vector<16xf32> to vector<16x1xf32>
    %cst_11 = arith.constant dense<0.000000e+00> : vector<1xf32>
    %17 = vector.multi_reduction <add>, %16, %cst_11 [0] : vector<16x1xf32> to vector<1xf32>
    %18 = vector.shape_cast %17 : vector<1xf32> to vector<1x1xf32>
    %19 = arith.addf %13, %18 : vector<1x1xf32>
    %c0_12 = arith.constant 0 : index
    %c0_13 = arith.constant 0 : index
    %20 = vector.load %arg5[%c0_12, %c0_13] : memref<1x1xf32, #tpu.memory_space<vmem>>, vector<1x1xf32>
    tpu.vector_store %arg5[%c0_12, %c0_13], %19 {strides = array<i32>} : memref<1x1xf32, #tpu.memory_space<vmem>>, vector<1x1xf32>,
    %c0_14 = arith.constant 0 : index
    %c0_15 = arith.constant 0 : index
    %21 = vector.load %arg6[%c0_14, %c0_15] : memref<1x1xf32, #tpu.memory_space<vmem>>, vector<1x1xf32>
    %22 = arith.mulf %11, %11 : vector<16x32xf32>
    %cst_16 = arith.constant dense<0.000000e+00> : vector<16xf32>
    %23 = vector.multi_reduction <add>, %22, %cst_16 [1] : vector<16x32xf32> to vector<16xf32>
    %24 = vector.shape_cast %23 : vector<16xf32> to vector<16x1xf32>
    %cst_17 = arith.constant dense<0.000000e+00> : vector<1xf32>
    %25 = vector.multi_reduction <add>, %24, %cst_17 [0] : vector<16x1xf32> to vector<1xf32>
    %26 = vector.shape_cast %25 : vector<1xf32> to vector<1x1xf32>
    %27 = arith.addf %21, %26 : vector<1x1xf32>
    %c0_18 = arith.constant 0 : index
    %c0_19 = arith.constant 0 : index
    %28 = vector.load %arg6[%c0_18, %c0_19] : memref<1x1xf32, #tpu.memory_space<vmem>>, vector<1x1xf32>
    tpu.vector_store %arg6[%c0_18, %c0_19], %27 {strides = array<i32>} : memref<1x1xf32, #tpu.memory_space<vmem>>, vector<1x1xf32>,
    %c0_20 = arith.constant 0 : index
    %c0_21 = arith.constant 0 : index
    %29 = vector.load %arg7[%c0_20, %c0_21] : memref<1x1xf32, #tpu.memory_space<vmem>>, vector<1x1xf32>
    %30 = vector.extract_strided_slice %12 {offsets = [2, 0], sizes = [14, 32], strides = [1, 1]} : vector<16x32xf32> to vector<14x32xf32>
    %31 = vector.extract_strided_slice %12 {offsets = [0, 0], sizes = [14, 32], strides = [1, 1]} : vector<16x32xf32> to vector<14x32xf32>
    %32 = arith.subf %30, %31 : vector<14x32xf32>
    %33 = vector.extract_strided_slice %12 {offsets = [1, 0], sizes = [1, 32], strides = [1, 1]} : vector<16x32xf32> to vector<1x32xf32>
    %34 = vector.extract_strided_slice %12 {offsets = [14, 0], sizes = [1, 32], strides = [1, 1]} : vector<16x32xf32> to vector<1x32xf32>
    %35 = arith.subf %33, %34 : vector<1x32xf32>
    %36 = arith.mulf %32, %32 : vector<14x32xf32>
    %cst_22 = arith.constant dense<0.000000e+00> : vector<14xf32>
    %37 = vector.multi_reduction <add>, %36, %cst_22 [1] : vector<14x32xf32> to vector<14xf32>
    %38 = vector.shape_cast %37 : vector<14xf32> to vector<14x1xf32>
    %cst_23 = arith.constant dense<0.000000e+00> : vector<1xf32>
    %39 = vector.multi_reduction <add>, %38, %cst_23 [0] : vector<14x1xf32> to vector<1xf32>
    %40 = vector.shape_cast %39 : vector<1xf32> to vector<1x1xf32>
    %41 = arith.mulf %35, %35 : vector<1x32xf32>
    %cst_24 = arith.constant dense<0.000000e+00> : vector<1xf32>
    %42 = vector.multi_reduction <add>, %41, %cst_24 [1] : vector<1x32xf32> to vector<1xf32>
    %43 = vector.shape_cast %42 : vector<1xf32> to vector<1x1xf32>
    %cst_25 = arith.constant dense<0.000000e+00> : vector<1xf32>
    %44 = vector.multi_reduction <add>, %43, %cst_25 [0] : vector<1x1xf32> to vector<1xf32>
    %45 = vector.shape_cast %44 : vector<1xf32> to vector<1x1xf32>
    %cst_26 = arith.constant 2.000000e+00 : f32
    %46 = vector.broadcast %cst_26 : f32 to vector<1x1xf32>
    %47 = arith.mulf %46, %45 : vector<1x1xf32>
    %48 = arith.addf %40, %47 : vector<1x1xf32>
    %49 = arith.addf %29, %48 : vector<1x1xf32>
    %c0_27 = arith.constant 0 : index
    %c0_28 = arith.constant 0 : index
    %50 = vector.load %arg7[%c0_27, %c0_28] : memref<1x1xf32, #tpu.memory_space<vmem>>, vector<1x1xf32>
    tpu.vector_store %arg7[%c0_27, %c0_28], %49 {strides = array<i32>} : memref<1x1xf32, #tpu.memory_space<vmem>>, vector<1x1xf32>,
    %c0_29 = arith.constant 0 : index
    %c0_30 = arith.constant 0 : index
    %51 = vector.load %arg8[%c0_29, %c0_30] : memref<1x1xf32, #tpu.memory_space<vmem>>, vector<1x1xf32>
    %52 = vector.extract_strided_slice %11 {offsets = [2, 0], sizes = [14, 32], strides = [1, 1]} : vector<16x32xf32> to vector<14x32xf32>
    %53 = vector.extract_strided_slice %11 {offsets = [0, 0], sizes = [14, 32], strides = [1, 1]} : vector<16x32xf32> to vector<14x32xf32>
    %54 = arith.subf %52, %53 : vector<14x32xf32>
    %55 = vector.extract_strided_slice %11 {offsets = [1, 0], sizes = [1, 32], strides = [1, 1]} : vector<16x32xf32> to vector<1x32xf32>
    %56 = vector.extract_strided_slice %11 {offsets = [14, 0], sizes = [1, 32], strides = [1, 1]} : vector<16x32xf32> to vector<1x32xf32>
    %57 = arith.subf %55, %56 : vector<1x32xf32>
    %58 = arith.mulf %54, %54 : vector<14x32xf32>
    %cst_31 = arith.constant dense<0.000000e+00> : vector<14xf32>
    %59 = vector.multi_reduction <add>, %58, %cst_31 [1] : vector<14x32xf32> to vector<14xf32>
    %60 = vector.shape_cast %59 : vector<14xf32> to vector<14x1xf32>
    %cst_32 = arith.constant dense<0.000000e+00> : vector<1xf32>
    %61 = vector.multi_reduction <add>, %60, %cst_32 [0] : vector<14x1xf32> to vector<1xf32>
    %62 = vector.shape_cast %61 : vector<1xf32> to vector<1x1xf32>
    %63 = arith.mulf %57, %57 : vector<1x32xf32>
    %cst_33 = arith.constant dense<0.000000e+00> : vector<1xf32>
    %64 = vector.multi_reduction <add>, %63, %cst_33 [1] : vector<1x32xf32> to vector<1xf32>
    %65 = vector.shape_cast %64 : vector<1xf32> to vector<1x1xf32>
    %cst_34 = arith.constant dense<0.000000e+00> : vector<1xf32>
    %66 = vector.multi_reduction <add>, %65, %cst_34 [0] : vector<1x1xf32> to vector<1xf32>
    %67 = vector.shape_cast %66 : vector<1xf32> to vector<1x1xf32>
    %cst_35 = arith.constant 2.000000e+00 : f32
    %68 = vector.broadcast %cst_35 : f32 to vector<1x1xf32>
    %69 = arith.mulf %68, %67 : vector<1x1xf32>
    %70 = arith.addf %62, %69 : vector<1x1xf32>
    %71 = arith.addf %51, %70 : vector<1x1xf32>
    %c0_36 = arith.constant 0 : index
    %c0_37 = arith.constant 0 : index
    %72 = vector.load %arg8[%c0_36, %c0_37] : memref<1x1xf32, #tpu.memory_space<vmem>>, vector<1x1xf32>
    tpu.vector_store %arg8[%c0_36, %c0_37], %71 {strides = array<i32>} : memref<1x1xf32, #tpu.memory_space<vmem>>, vector<1x1xf32>,
    %c0_i32_38 = arith.constant 0 : i32
    %73 = arith.cmpi eq, %arg1, %c0_i32_38 : i32
    %74 = arith.extui %73 : i1 to i32
    %c0_i32_39 = arith.constant 0 : i32
    %75 = arith.cmpi ne, %74, %c0_i32_39 : i32
    scf.if %75 {
      %c0_42 = arith.constant 0 : index
      %c0_43 = arith.constant 0 : index
      %81 = vector.load %arg5[%c0_42, %c0_43] : memref<1x1xf32, #tpu.memory_space<vmem>>, vector<1x1xf32>
      %82 = math.sqrt %81 : vector<1x1xf32>
      %c0_44 = arith.constant 0 : index
      %c0_45 = arith.constant 0 : index
      %83 = vector.load %arg6[%c0_44, %c0_45] : memref<1x1xf32, #tpu.memory_space<vmem>>, vector<1x1xf32>
      %84 = math.sqrt %83 : vector<1x1xf32>
      %cst_46 = arith.constant 9.99999997E-7 : f32
      %85 = vector.broadcast %cst_46 : f32 to vector<1x1xf32>
      %86 = arith.addf %84, %85 : vector<1x1xf32>
      %87 = arith.divf %82, %86 : vector<1x1xf32>
      %c0_47 = arith.constant 0 : index
      %c0_48 = arith.constant 0 : index
      %88 = vector.load %arg7[%c0_47, %c0_48] : memref<1x1xf32, #tpu.memory_space<vmem>>, vector<1x1xf32>
      %89 = math.sqrt %88 : vector<1x1xf32>
      %cst_49 = arith.constant 8.000000e+00 : f32
      %90 = vector.broadcast %cst_49 : f32 to vector<1x1xf32>
      %91 = arith.mulf %90, %89 : vector<1x1xf32>
      %c0_50 = arith.constant 0 : index
      %c0_51 = arith.constant 0 : index
      %92 = vector.load %arg8[%c0_50, %c0_51] : memref<1x1xf32, #tpu.memory_space<vmem>>, vector<1x1xf32>
      %93 = math.sqrt %92 : vector<1x1xf32>
      %cst_52 = arith.constant 8.000000e+00 : f32
      %94 = vector.broadcast %cst_52 : f32 to vector<1x1xf32>
      %95 = arith.mulf %94, %93 : vector<1x1xf32>
      %cst_53 = arith.constant 9.99999997E-7 : f32
      %96 = vector.broadcast %cst_53 : f32 to vector<1x1xf32>
      %97 = arith.addf %95, %96 : vector<1x1xf32>
      %98 = arith.divf %91, %97 : vector<1x1xf32>
      %c0_54 = arith.constant 0 : index
      %c0_55 = arith.constant 0 : index
      %99 = vector.load %arg9[%c0_54, %c0_55] : memref<1x1xf32, #tpu.memory_space<vmem>>, vector<1x1xf32>
      %100 = arith.addf %99, %87 : vector<1x1xf32>
      %c0_56 = arith.constant 0 : index
      %c0_57 = arith.constant 0 : index
      %101 = vector.load %arg9[%c0_56, %c0_57] : memref<1x1xf32, #tpu.memory_space<vmem>>, vector<1x1xf32>
      tpu.vector_store %arg9[%c0_56, %c0_57], %100 {strides = array<i32>} : memref<1x1xf32, #tpu.memory_space<vmem>>, vector<1x1xf32>,
      %c0_58 = arith.constant 0 : index
      %c0_59 = arith.constant 0 : index
      %102 = vector.load %arg10[%c0_58, %c0_59] : memref<1x1xf32, #tpu.memory_space<vmem>>, vector<1x1xf32>
      %103 = arith.addf %102, %98 : vector<1x1xf32>
      %c0_60 = arith.constant 0 : index
      %c0_61 = arith.constant 0 : index
      %104 = vector.load %arg10[%c0_60, %c0_61] : memref<1x1xf32, #tpu.memory_space<vmem>>, vector<1x1xf32>
      tpu.vector_store %arg10[%c0_60, %c0_61], %103 {strides = array<i32>} : memref<1x1xf32, #tpu.memory_space<vmem>>, vector<1x1xf32>,
    } else {
    }
    %c1_i32 = arith.constant 1 : i32
    %76 = arith.cmpi eq, %arg0, %c1_i32 : i32
    %c0_i32_40 = arith.constant 0 : i32
    %77 = arith.cmpi eq, %arg1, %c0_i32_40 : i32
    %78 = arith.andi %76, %77 : i1
    %79 = arith.extui %78 : i1 to i32
    %c0_i32_41 = arith.constant 0 : i32
    %80 = arith.cmpi ne, %79, %c0_i32_41 : i32
    scf.if %80 {
      %c0_42 = arith.constant 0 : index
      %c0_43 = arith.constant 0 : index
      %81 = vector.load %arg9[%c0_42, %c0_43] : memref<1x1xf32, #tpu.memory_space<vmem>>, vector<1x1xf32>
      %cst_44 = arith.constant 2.000000e+00 : f32
      %82 = vector.broadcast %cst_44 : f32 to vector<1x1xf32>
      %83 = arith.divf %81, %82 : vector<1x1xf32>
      %c0_45 = arith.constant 0 : index
      %c0_46 = arith.constant 0 : index
      %84 = vector.load %arg10[%c0_45, %c0_46] : memref<1x1xf32, #tpu.memory_space<vmem>>, vector<1x1xf32>
      %cst_47 = arith.constant 2.000000e+00 : f32
      %85 = vector.broadcast %cst_47 : f32 to vector<1x1xf32>
      %86 = arith.divf %84, %85 : vector<1x1xf32>
      %cst_48 = arith.constant 1.000000e+00 : f32
      %87 = vector.broadcast %cst_48 : f32 to vector<1x1xf32>
      %88 = arith.mulf %87, %83 : vector<1x1xf32>
      %cst_49 = arith.constant 1.000000e-03 : f32
      %89 = vector.broadcast %cst_49 : f32 to vector<1x1xf32>
      %90 = arith.mulf %89, %86 : vector<1x1xf32>
      %91 = arith.addf %88, %90 : vector<1x1xf32>
      %c0_50 = arith.constant 0 : index
      %c0_51 = arith.constant 0 : index
      %92 = vector.load %arg4[%c0_50, %c0_51] : memref<1x1xf32, #tpu.memory_space<vmem>>, vector<1x1xf32>
      tpu.vector_store %arg4[%c0_50, %c0_51], %91 {strides = array<i32>} : memref<1x1xf32, #tpu.memory_space<vmem>>, vector<1x1xf32>,
    } else {
    }
    return
  }
  func.func @transform_0(%arg0: i32, %arg1: i32) -> (i32, i32, i32) {
    %c0_i32 = arith.constant 0 : i32
    %c0_i32_0 = arith.constant 0 : i32
    return %arg0, %c0_i32, %arg1 : i32, i32, i32
  }
  func.func @transform_1(%arg0: i32, %arg1: i32) -> (i32, i32, i32) {
    %c0_i32 = arith.constant 0 : i32
    %c0_i32_0 = arith.constant 0 : i32
    return %arg0, %c0_i32, %arg1 : i32, i32, i32
  }
  func.func @transform_2(%arg0: i32, %arg1: i32) -> (i32, i32) {
    %c0_i32 = arith.constant 0 : i32
    %c0_i32_0 = arith.constant 0 : i32
    %c0_i32_1 = arith.constant 0 : i32
    return %c0_i32, %c0_i32_0 : i32, i32
  }
}

</mosaic_0001>

<bundles_post_ra>
// kernel: tpu_custom_call.1
= control target key start
LH: loop header
LB: loop body
LE: loop exit
PB: predicated region body
PF: predicated region fallthrough
CT: control target
= control target key end

     0   :  { %7 = vsyncpa [#allocation9], 0  ;;  %s966_s0 = inlined_call_operand.hbm [shape: f32[2,16,32], index: 0, kind: input, shape index: {}]   ;;  %s967_s1 = inlined_call_operand.hbm [shape: f32[2,16,32], index: 1, kind: input, shape index: {}]   ;;  %s968_s2 = inlined_call_operand.hbm [shape: f32[1,1], index: 2, kind: output, shape index: {}]  }
   0x1   :  { %9 = vsyncpa [#allocation9 + $0x1], 0 }
   0x2   :  { %10 = vsyncpa [#allocation12], 0 }
   0x3   :  { %12 = vsyncpa [#allocation12 + $0x1], 0 }
   0x4   :  { %13 = vsyncpa [#allocation10], 0  ;;  %s797_s9 = smov 0   ;;  %s799_s10 = smov 0  }
   0x5   :  { %s801_s11 = smov 0   ;;  %s803_s12 = smov 0  }
   0x6   :  { %s805_s13 = smov 0   ;;  %s807_s14 = smov 0  }
   0x7 LB: > { %s530_s15 = sadd.s32 4294967295, %s773_s14   ;;  %s31_s16 = sadd.s32 1, %s769_s13  ;;  %s773_s14 = sphi %s807_s14, %s19_s14   ;;  %s769_s13 = sphi %s805_s13, %s978_s13   ;;  %s765_s12 = sphi %s803_s12, %s977_s12   ;;  %s761_s11 = sphi %s801_s11, %s976_s11   ;;  %s757_s10 = sphi %s799_s10, %s975_s10   ;;  %s753_s9 = sphi %s797_s9, %s974_s9  }
   0x8   : > { %p33_p0 = scmp.ge.s32.totalorder %s31_s16, 2  ;;  %s40_s17 = sadd.s32 1, %s761_s11 }
   0x9   : > { %p47_p1 = scmp.ne.s32.totalorder %s761_s11, %s757_s10  ;;  %p48_p2 = scmp.eq.s32.totalorder %s773_s14, 0 }
   0xa   : > { %s980_s16 = smov (%p33_p0, %s31_s16), 0  ;;  %p53_p4 = scmp.ne.s32.totalorder %s757_s10, %s753_s9 }
   0xb   : > { %p833_p3 = por %p48_p2, %p47_p1  ;;  %s35_s19 = ssub.s32 %s769_s13, %s980_s16 }
   0xc   : > { %p54_p5 = scmp.eq.s32.totalorder %s530_s15, 0  ;;  %p38_p6 = scmp.eq.s32.totalorder %s35_s19, 0 }
   0xd   : > { %p567_p8 = scmp.lt.s32.totalorder %s773_s14, 2  ;;  %s851_s22 = sand.u32 1, %s761_s11  }
   0xe   : > { %p842_p7 = por %p54_p5, %p53_p4  ;;  %s548_s23 = sshll.u32 %s769_s13, 8 }
   0xf   : > { %s848_s21 = scalar_select %p38_p6, %s761_s11, %s40_s17  }
  0x10   : > { %s533_s24 = sshll.u32 %s851_s22, 4  ;;  %s137_s27 = scalar_lea.hbm %s966_s0, %s548_s23 }
  0x11   : > { %s130_s28 = scalar_lea.vmem [#allocation8], %s533_s24  ;;  %p862_p9 = pnand %p567_p8, %p833_p3 }
  0x12   : > { %s138_s29 = sshll.u32 %s130_s28, 4  ;;  %s127_s3 = scalar_lea.sflag [#allocation9], %s851_s22  ;;  %s139_s29 = int_to_ptr.vmem [resolvable:$true] %s138_s29 }
  0x13   : > { %p637_p10 = pneg %p862_p9  ;;  %s648_s4 = scalar_lea.vmem %s139_s29, 256 }
  0x14   : > { %p649_p11 = scmp.ne.s32.totalorder %s139_s29, %s648_s4  ;;  %s775_s5 = smov [#allocation8]  }
  0x15   : > { %s653_s6 = sshll.u32 %s775_s5, 4  ;;  %s654_s6 = int_to_ptr.vmem [resolvable:$false] %s653_s6 }
  0x16   : > { %p651_p12 = pnand %p649_p11, %p637_p10  ;;  %s655_s7 = scalar_lea.vmem %s654_s6, 512 }
  0x17   : > { %p656_p0 = scmp.lt.s32.totalorder %s139_s29, %s654_s6  ;;  %p657_p1 = scmp.lt.s32.totalorder %s655_s7, %s648_s4 }
  0x18   : > { %p652_p13 = pneg %p651_p12 }
  0x19   : > { %p658_p2 = por %p657_p1, %p656_p0 }
  0x1b   : > { %p659_p3 = pnand %p658_p2, %p652_p13 }
  0x1d   : > { %662 = shalt.err (!%p659_p3)
}
  0x1e   : > { %s776_s8 = smov 128   ;;  %s777_s9 = smov 8  }
  0x1f   : > { %563 = dma.hbm_to_vmem [thread:$0]  (!%p862_p9), %s137_s27, 256, %s139_s29, %s127_s3, %s776_s8, %s776_s8, %s777_s9  }
  0x20   : > { %p539_p4 = scmp.ge.s32.totalorder %s773_s14, 1  ;;  %p168_p5 = scmp.lt.s32.totalorder %s773_s14, 3 }
  0x21   : > { %s159_s25 = scalar_lea.hbm %s967_s1, %s548_s23  ;;  %s152_s26 = scalar_lea.vmem [#allocation11], %s533_s24 }
  0x22   : > { %p876_p6 = pnand %p539_p4, %p168_p5  ;;  %s160_s28 = sshll.u32 %s152_s26, 4  ;;  %s161_s28 = int_to_ptr.vmem [resolvable:$true] %s160_s28 }
  0x23   : > { %s149_s4 = scalar_lea.sflag [#allocation12], %s851_s22  ;;  %s676_s5 = scalar_lea.vmem %s161_s28, 256 }
  0x24   : > { %p677_p8 = scmp.ne.s32.totalorder %s161_s28, %s676_s5  ;;  %s778_s27 = smov [#allocation11]  }
  0x25   : > { %s681_s29 = sshll.u32 %s778_s27, 4  ;;  %s682_s29 = int_to_ptr.vmem [resolvable:$false] %s681_s29 }
  0x26   : > { %p679_p11 = pnand %p677_p8, %p637_p10  ;;  %s683_s3 = scalar_lea.vmem %s682_s29, 512 }
  0x27   : > { %p684_p13 = scmp.lt.s32.totalorder %s161_s28, %s682_s29  ;;  %p685_p0 = scmp.lt.s32.totalorder %s683_s3, %s676_s5 }
  0x28   : > { %p680_p12 = pneg %p679_p11 }
  0x29   : > { %p686_p1 = por %p685_p0, %p684_p13 }
  0x2b   : > { %p687_p2 = pnand %p686_p1, %p680_p12 }
  0x2d   : > { %690 = shalt.err (!%p687_p2)
}
  0x2e   : > { %566 = dma.hbm_to_vmem [thread:$0]  (!%p862_p9), %s159_s25, 256, %s161_s28, %s149_s4, %s776_s8, %s776_s8, %s777_s9  }
  0x2f   : > { %172 = sbr.rel (%p876_p6) target bundleno = 313 (0x139), region = 28  ;;  %s174_s22 = sand.u32 (!%p876_p6), 1, %s757_s10  }
  0x30   : > { %s540_s23 = sshll.u32 (!%p876_p6), %s174_s22, 4  ;;  %s175_s24 = scalar_lea.sflag (!%p876_p6), [#allocation9], %s174_s22 }
  0x31   : > { %s178_s6 = scalar_lea.vmem (!%p876_p6), [#allocation8], %s540_s23 }
  0x34   : > { %740 = dma.done.wait (%p842_p7), %s175_s24, 256  }
  0x35   : > { %742 = vsyncadd (%p842_p7), %s175_s24, 4294967040  ;;  %s184_s7 = scalar_lea.sflag [#allocation12], %s174_s22  ;;  %s187_s18 = scalar_lea.vmem [#allocation11], %s540_s23 }
  0x36   : > { %744 = dma.done.wait (%p842_p7), %s184_s7, 256  }
  0x37   : > { %746 = vsyncadd (%p842_p7), %s184_s7, 4294967040  ;;  %p208_p9 = scmp.eq.s32.totalorder %s765_s12, 0 }
  0x38   : > { %vm214_vm0 = vcmask (%p208_p9), 0   ;;  %v779_v0 = vmov (%p208_p9), 0.0  }
  0x39   : > { %213 = sbr.rel (!%p208_p9) target bundleno = 62 (0x3e), region = 40  ;;  %215 = vst.msk [vmem:[#allocation6] sm:$0x1] (%p208_p9), %vm214_vm0, %v779_v0  ;;  %216 = vst.msk [vmem:[#allocation7] sm:$0x1] (%p208_p9), %vm214_vm0, %v779_v0 }
  0x3e PF: > { %v227_v1 = vld [vmem:[%s187_s18] sm:$0xff]  ;;  %vm234_vm1 = vcmask 261120   ;;  %v228_v2 = vld [vmem:[%s187_s18 + $0x8] sm:$0xff]  ;;  %vm272_vm2 = vcmask 1041408   ;;  %vm285_vm3 = vcmask 261122   ;;  %vm309_vm4 = vcmask 254977  }
  0x3f   : > { %v252_v3 = vmul.f32 %v227_v1, %v227_v1  ;;  %v327_v4 = vrot.slane %v227_v1, 6  ;;  %v253_v5 = vmul.f32 %v228_v2, %v228_v2  ;;  %v328_v6 = vrot.slane %v228_v2, 6  ;;  %v225_v7 = vld [vmem:[%s178_s6] sm:$0xff]  ;;  %v226_v8 = vld [vmem:[%s178_s6 + $0x8] sm:$0xff]  ;;  %p424_p7 = scmp.eq.s32.totalorder %s765_s12, 1 }
  0x40   : > { %v334_v9 = vrot.slane %v228_v2, 5  ;;  %v229_v10 = vsub.f32 %v225_v7, %v227_v1  ;;  %v230_v11 = vsub.f32 %v226_v8, %v228_v2  ;;  %vm220_vm5 = vcmask 0  }
  0x41   : > { %v254_v12 = vsel %vm234_vm1, %v252_v3, 0.0  ;;  %v332_v13 = vsub.f32 %v227_v1, %v327_v4  ;;  %v329_v14 = vsel %vm272_vm2, %v327_v4, %v328_v6  ;;  %v257_v19 = vsel %vm234_vm1, %v253_v5, 0.0 }
  0x42   : > { %255 = vadd.xlane.f32.xlu1 %v254_v12  ;;  %v333_v15 = vsub.f32 %v228_v2, %v329_v14  ;;  %v273_v16 = vrot.slane %v229_v10, 6  ;;  %v274_v17 = vrot.slane %v230_v11, 6  ;;  %v336_v20 = vsub.f32 %v227_v1, %v334_v9 }
  0x43   : > { %v337_v18 = vmul.f32 %v332_v13, %v332_v13  ;;  %v280_v21 = vrot.slane %v230_v11, 5  ;;  %v232_v27 = vmul.f32 %v229_v10, %v229_v10  ;;  %v233_v38 = vmul.f32 %v230_v11, %v230_v11 }
  0x44   : > { %v338_v22 = vmul.f32 %v333_v15, %v333_v15  ;;  %v278_v23 = vsub.f32 %v229_v10, %v273_v16  ;;  %v275_v24 = vsel %vm272_vm2, %v273_v16, %v274_v17  ;;  %v360_v29 = vmul.f32 %v336_v20, %v336_v20 }
  0x45   : > { %v339_v25 = vsel %vm285_vm3, %v337_v18, 0.0  ;;  %v279_v30 = vsub.f32 %v230_v11, %v275_v24  ;;  %v282_v31 = vsub.f32 %v229_v10, %v280_v21  ;;  %v235_v35 = vsel %vm234_vm1, %v232_v27, 0.0 }
  0x46   : > { %340 = vadd.xlane.f32.xlu0 %v339_v25  ;;  %258 = vadd.xlane.f32.xlu1 %v257_v19  ;;  %v283_v26 = vmul.f32 %v278_v23, %v278_v23  ;;  %v342_v28 = vsel %vm234_vm1, %v338_v22, 0.0  ;;  %v361_v33 = vsel %vm309_vm4, %v360_v29, 0.0  ;;  %v780_v40 = vmov 0.0  }
  0x47   : > { %v284_v34 = vmul.f32 %v279_v30, %v279_v30  ;;  %v308_v36 = vmul.f32 %v282_v31, %v282_v31  ;;  %222 = vst.msk [vmem:[#allocation3] sm:$0x1] %vm220_vm5, %v780_v40  ;;  %221 = vst.msk [vmem:[#allocation2] sm:$0x1] %vm220_vm5, %v780_v40  ;;  %v238_v41 = vsel %vm234_vm1, %v233_v38, 0.0  ;;  %vm294_vm6 = vcmask 1045504  }
  0x48   : > { %v286_v32 = vsel %vm285_vm3, %v283_v26, 0.0  ;;  %223 = vst.msk [vmem:[#allocation4] sm:$0x1] %vm220_vm5, %v780_v40  ;;  %224 = vst.msk [vmem:[#allocation5] sm:$0x1] %vm220_vm5, %v780_v40  ;;  %v317_v63 = vlaneseq }
  0x49   : > { %v289_v37 = vsel %vm234_vm1, %v284_v34, 0.0  ;;  %v310_v39 = vsel %vm309_vm4, %v308_v36, 0.0 }
  0x4a   : > { %343 = vadd.xlane.f32.xlu0 %v342_v28  ;;  %287 = vadd.xlane.f32.xlu1 %v286_v32  ;;  %v318_v8 = vshrl.u32 %v317_v63, 7 }
  0x4c   : > { %v319_v16 = vsub.s32 1, %v318_v8 }
  0x4e   : > { %362 = vadd.xlane.f32.xlu0 %v361_v33  ;;  %236 = vadd.xlane.f32.xlu1 %v235_v35  ;;  %v251_v61 = vld [vmem:[#allocation3] sm:$0x1]  ;;  %v231_v35 = vld [vmem:[#allocation2] sm:$0x1] }
  0x4f   : > { %v324_v23 = vld [vmem:[#allocation5] sm:$0x1]  ;;  %v269_v38 = vld [vmem:[#allocation4] sm:$0x1] }
  0x52   : > { %290 = vadd.xlane.f32.xlu0 %v289_v37  ;;  %311 = vadd.xlane.f32.xlu1 %v310_v39 }
  0x56   : > { %239 = vadd.xlane.f32.xlu0 %v238_v41 }
  0xcb   : > { %v256_v42 = vpop.xlane.xlu1 %255 }
  0xcf   : > { %v341_v43 = vpop.xlane.xlu0 %340  ;;  %v259_v44 = vpop.xlane.xlu1 %258 }
  0xd0   : > { %v260_v45 = vadd.f32 %v259_v44, %v256_v42  ;;  %v347_v48 = vrot.slane %v341_v43, 2 }
  0xd2   : > { %v261_v46 = vrot.slane %v260_v45, 4 }
  0xd3   : > { %v344_v47 = vpop.xlane.xlu0 %343  ;;  %v288_v56 = vpop.xlane.xlu1 %287 }
  0xd4   : > { %v262_v49 = vadd.f32 %v261_v46, %v260_v45  ;;  %v348_v50 = vrot.slane %v344_v47, 2  ;;  %v295_v60 = vrot.slane %v288_v56, 2 }
  0xd6   : > { %v263_v51 = vrot.slane %v262_v49, 2  ;;  %v349_v52 = vsel %vm294_vm6, %v347_v48, %v348_v50  ;;  %v352_v53 = vsel %vm294_vm6, %v348_v50, 0.0 }
  0xd7   : > { %v353_v54 = vadd.f32 %v352_v53, %v349_v52  ;;  %v363_v55 = vpop.xlane.xlu0 %362  ;;  %v237_v4 = vpop.xlane.xlu1 %236 }
  0xd8   : > { %v264_v57 = vadd.f32 %v263_v51, %v262_v49  ;;  %v365_v18 = vmul.f32 2.0, %v363_v55 }
  0xd9   : > { %v354_v58 = vrot.slane %v353_v54, 4 }
  0xda   : > { %v265_v59 = vrot.slane %v264_v57, 1 }
  0xdb   : > { %v355_v62 = vadd.f32 %v354_v58, %v353_v54  ;;  %v291_v0 = vpop.xlane.xlu0 %290  ;;  %v312_v25 = vpop.xlane.xlu1 %311 }
  0xdc   : > { %v266_v1 = vadd.f32 %v265_v59, %v264_v57  ;;  %v296_v2 = vrot.slane %v291_v0, 2  ;;  %v314_v32 = vmul.f32 2.0, %v312_v25  ;;  %v418_v0 = vld [vmem:[#allocation6] sm:$0x1] }
  0xdd   : > { %v356_v3 = vrot.slane %v355_v62, 2 }
  0xde   : > { %v267_v5 = vadd.f32 %v266_v1, %v251_v61  ;;  %v297_v6 = vsel %vm294_vm6, %v295_v60, %v296_v2  ;;  %v300_v7 = vsel %vm294_vm6, %v296_v2, 0.0 }
  0xdf   : > { %v357_v9 = vadd.f32 %v356_v3, %v355_v62  ;;  %v301_v10 = vadd.f32 %v300_v7, %v297_v6  ;;  %v240_v11 = vpop.xlane.xlu0 %239 }
  0xe0   : > { %268 = vst.msk [vmem:[#allocation3] sm:$0x1] %vm220_vm5, %v267_v5  ;;  %v241_v12 = vadd.f32 %v240_v11, %v237_v4 }
  0xe1   : > { %v358_v13 = vrot.slane %v357_v9, 1  ;;  %v302_v14 = vrot.slane %v301_v10, 4 }
  0xe2   : > { %v242_v15 = vrot.slane %v241_v12, 4 }
  0xe3   : > { %v359_v17 = vadd.f32 %v358_v13, %v357_v9  ;;  %v303_v19 = vadd.f32 %v302_v14, %v301_v10  ;;  %v421_v10 = vld [vmem:[#allocation7] sm:$0x1] }
  0xe4   : > { %v243_v20 = vadd.f32 %v242_v15, %v241_v12 }
  0xe5   : > { %v366_v21 = vadd.f32 %v365_v18, %v359_v17  ;;  %v304_v22 = vrot.slane %v303_v19, 2 }
  0xe6   : > { %v244_v24 = vrot.slane %v243_v20, 2 }
  0xe7   : > { %v386_v26 = vld [vmem:[#allocation3] sm:$0x1]  ;;  %v371_v27 = vrot.slane %v366_v21, %v319_v16  ;;  %v305_v28 = vadd.f32 %v304_v22, %v303_v19 }
  0xe8   : > { %623 = vrsqrt.f32 %v386_v26  ;;  %v245_v30 = vadd.f32 %v244_v24, %v243_v20  ;;  %vm389_vm7 = vcmp.eq.f32.partialorder %v386_v26, inf  ;;  %v392_v45 = vand.u32 2147483648, %v386_v26 }
  0xe9   : > { %v373_v29 = vadd.f32 %v371_v27, %v324_v23  ;;  %v306_v31 = vrot.slane %v305_v28, 1  ;;  %vm391_vm8 = vcmp.eq.f32.partialorder %v386_v26, 0.0 }
  0xea   : > { %v246_v33 = vrot.slane %v245_v30, 1 }
  0xeb   : > { %374 = vst.msk [vmem:[#allocation5] sm:$0x1] %vm220_vm5, %v373_v29  ;;  %v307_v34 = vadd.f32 %v306_v31, %v305_v28 }
  0xec   : > { %v247_v36 = vadd.f32 %v246_v33, %v245_v30 }
  0xed   : > { %v315_v37 = vadd.f32 %v314_v32, %v307_v34 }
  0xee   : > { %v248_v39 = vadd.f32 %v247_v36, %v231_v35 }
  0xef   : > { %v320_v40 = vrot.slane %v315_v37, %v319_v16 }
  0xf0   : > { %250 = vst.msk [vmem:[#allocation2] sm:$0x1] %vm220_vm5, %v248_v39 }
  0xf1   : > { %v322_v41 = vadd.f32 %v320_v40, %v269_v38 }
  0xf2   : > { %v406_v42 = vld [vmem:[#allocation5] sm:$0x1] }
  0xf3   : > { %625 = vrsqrt.f32 %v406_v42  ;;  %323 = vst.msk [vmem:[#allocation4] sm:$0x1] %vm220_vm5, %v322_v41  ;;  %vm409_vm9 = vcmp.eq.f32.partialorder %v406_v42, inf  ;;  %v412_v53 = vand.u32 2147483648, %v406_v42  ;;  %vm411_vm10 = vcmp.eq.f32.partialorder %v406_v42, 0.0 }
  0xf5   : > { %v624_v43 = vpop.eup %623 }
  0xf6   : > { %v388_v44 = vmul.f32 %v624_v43, %v386_v26 }
  0xf7   : > { %v378_v47 = vld [vmem:[#allocation2] sm:$0x1] }
  0xf8   : > { %v390_v46 = vsel %vm389_vm7, %v386_v26, %v388_v44  ;;  %627 = vrsqrt.f32 %v378_v47  ;;  %vm381_vm11 = vcmp.eq.f32.partialorder %v378_v47, inf  ;;  %v384_v61 = vand.u32 2147483648, %v378_v47 }
  0xf9   : > { %v393_v48 = vsel %vm391_vm8, %v392_v45, %v390_v46  ;;  %vm383_vm12 = vcmp.eq.f32.partialorder %v378_v47, 0.0 }
  0xfa   : > { %v394_v49 = vadd.f32 1e-06, %v393_v48  ;;  %v397_v50 = vld [vmem:[#allocation4] sm:$0x1] }
  0xfb   : > { %629 = vrsqrt.f32 %v397_v50  ;;  %vm400_vm13 = vcmp.eq.f32.partialorder %v397_v50, inf  ;;  %v403_v6 = vand.u32 2147483648, %v397_v50  ;;  %vm402_vm14 = vcmp.eq.f32.partialorder %v397_v50, 0.0 }
  0xfc   : > { %631 = vrcp.f32 %v394_v49 }
 0x100   : > { %v626_v51 = vpop.eup %625 }
 0x101   : > { %v408_v52 = vmul.f32 %v626_v51, %v406_v42 }
 0x103   : > { %v410_v54 = vsel %vm409_vm9, %v406_v42, %v408_v52 }
 0x104   : > { %v413_v55 = vsel %vm411_vm10, %v412_v53, %v410_v54 }
 0x105   : > { %v414_v56 = vmul.f32 8.0, %v413_v55  ;;  %v628_v57 = vpop.eup %627 }
 0x106   : > { %v380_v59 = vmul.f32 %v628_v57, %v378_v47 }
 0x107   : > { %v415_v58 = vadd.f32 1e-06, %v414_v56 }
 0x108   : > { %v630_v60 = vpop.eup %629  ;;  %v382_v63 = vsel %vm381_vm11, %v378_v47, %v380_v59 }
 0x109   : > { %v632_v62 = vpop.eup %631  ;;  %633 = vrcp.f32 %v415_v58  ;;  %v385_v1 = vsel %vm383_vm12, %v384_v61, %v382_v63  ;;  %v399_v3 = vmul.f32 %v630_v60, %v397_v50 }
 0x10a   : > { %v396_v2 = vmul.f32 %v632_v62, %v385_v1 }
 0x10b   : > { %v401_v5 = vsel %vm400_vm13, %v397_v50, %v399_v3 }
 0x10c   : > { %v419_v4 = vadd.f32 %v418_v0, %v396_v2  ;;  %v404_v7 = vsel %vm402_vm14, %v403_v6, %v401_v5 }
 0x10d   : > { %v405_v8 = vmul.f32 8.0, %v404_v7 }
 0x10e   : > { %420 = vst.msk [vmem:[#allocation6] sm:$0x1] %vm220_vm5, %v419_v4 }
 0x115   : > { %v429_v13 = vld [vmem:[#allocation6] sm:$0x1] (%p424_p7) }
 0x116   : > { %v634_v9 = vpop.eup %633  ;;  %v431_v15 = vmul.f32 (%p424_p7), 0.5, %v429_v13 }
 0x117   : > { %v417_v11 = vmul.f32 %v634_v9, %v405_v8  ;;  %428 = sbr.rel (!%p424_p7) target bundleno = 298 (0x12a), region = 52 }
 0x119   : > { %v422_v12 = vadd.f32 %v421_v10, %v417_v11 }
 0x11b   : > { %423 = vst.msk [vmem:[#allocation7] sm:$0x1] %vm220_vm5, %v422_v12 }
 0x122   : > { %v432_v14 = vld [vmem:[#allocation7] sm:$0x1] }
 0x123   : > { %v433_v16 = vmul.f32 0.5, %v432_v14 }
 0x125   : > { %v434_v17 = vmul.f32 0.001, %v433_v16 }
 0x127   : > { %v435_v18 = vadd.f32 %v434_v17, %v431_v15 }
 0x129   : > { %436 = vst.msk [vmem:[#allocation13] sm:$0x1] %vm220_vm5, %v435_v18 }
 0x12a PF: > { %p933_p10 = scmp.eq.s32.totalorder %s530_s15, 1  ;;  %s781_s30 = smov [#allocation13]  }
 0x12b   : > { %s444_s8 = sshll.u32 %s781_s30, 4  ;;  %s445_s8 = int_to_ptr.vmem [resolvable:$true] %s444_s8 }
 0x12c   : > { %s691_s12 = scalar_lea.vmem %s445_s8, 16  ;;  %s697_s9 = scalar_lea.vmem %s445_s8, 32 }
 0x12d   : > { %p692_p3 = scmp.ne.s32.totalorder %s445_s8, %s691_s12  ;;  %p698_p6 = scmp.lt.s32.totalorder %s445_s8, %s445_s8 }
 0x12e   : > { %p699_p8 = scmp.lt.s32.totalorder %s697_s9, %s691_s12 }
 0x12f   : > { %p693_p4 = pnand %p692_p3, %p933_p10 }
 0x130   : > { %p700_p11 = por %p699_p8, %p698_p6 }
 0x131   : > { %p694_p5 = pneg %p693_p4 }
 0x133   : > { %p701_p12 = pnand %p700_p11, %p694_p5 }
 0x135   : > { %704 = shalt.err (!%p701_p12)
}
 0x136   : > { %557 = dma.vmem_to_hbm [thread:$0]  (%p933_p10), %s445_s8, 16, %s968_s2, [#allocation10]  }
 0x137   : > { %748 = dma.done.wait (%p933_p10), [#allocation10], 16  }
 0x138   : > { %750 = vsyncadd (%p933_p10), [#allocation10], 4294967280 }
 0x139 PF: > { %s19_s14 = sadd.s32 1, %s773_s14   ;;  %s974_s9 = smov %s757_s10 }
 0x13a   : > { %p16_p13 = scmp.ge.s32.totalorder %s19_s14, 4   ;;  %s975_s10 = smov %s761_s11 }
 0x13b   : > { %s976_s11 = smov %s848_s21  ;;  %s977_s12 = smov %s769_s13 }
 0x13c   : > { %s978_s13 = smov %s980_s16  ;;  %18 = sbr.rel (!%p16_p13) target bundleno = 7 (0x7), region = 94 }
 0x141   :  { %457 = vsyncpa [#allocation9], 1 }
 0x142   :  { %459 = vsyncpa [#allocation9 + $0x1], 1 }
 0x143   :  { %460 = vsyncpa [#allocation12], 1 }
 0x144   :  { %462 = vsyncpa [#allocation12 + $0x1], 1 }
 0x145   :  { %463 = vsyncpa [#allocation10], 1 }
 0x146   :  { %465 = vsyncpa [#allocation10 + $0x1], 1 }

</bundles_post_ra>
